<compile_context>
chip_gen: v5e
topology: v5e:2x2
jax: 0.10.0
libtpu: 0.0.40
codegen_flags: <defaults>
</compile_context>

<pallas_src>
import jax
import jax.numpy as jnp
from jax.experimental import pallas as pl
from jax.experimental.pallas import tpu as pltpu

NUM_CLASSES = 10
IN_FEATURES = 200

PAD_C = 128        # lane-width accumulator inside the kernel (MXU emits 128 lanes anyway)
MAX_TILE_N = 4096  # cap on the batch tile for the gridded path
SMALL_N = 512      # gridless single-shot threshold


def _round_up(x, m):
    return ((x + m - 1) // m) * m


def _classifier_kernel(x_ref, w_ref, b_ref, o_ref):
    # (tile_n, 200) @ (200, 128) on the MXU with f32 accumulation (Mosaic pads K
    # internally), bias add on the 128-lane accumulator, then store only the real
    # class columns (narrow store; store slot is nowhere near the bottleneck here).
    acc = jnp.dot(x_ref[...], w_ref[...], preferred_element_type=jnp.float32)
    acc = acc + b_ref[...]
    o_ref[...] = acc[:, : o_ref.shape[-1]].astype(o_ref.dtype)


def prepare_params(weight_t, bias):
    """Pad the tiny classifier params once (hoisted out of the per-call path).

    weight_t: (200, C) f32 (== PyTorch weight.T), bias: (C,) f32
    -> w_p: (200, 128), b_p: (1, 128), zero-padded (numerically exact).
    """
    c = weight_t.shape[1]
    w_p = jnp.pad(weight_t, ((0, 0), (0, PAD_C - c)))
    b_p = jnp.pad(bias.reshape(1, -1), ((0, 0), (0, PAD_C - c)))
    return w_p, b_p


@jax.jit
def phase_a_net_forward(features, w_p, b_p):
    """features: (N, 200) f32, w_p/b_p from prepare_params
    -> logits: (N, NUM_CLASSES) f32 == features @ weight_t + bias."""
    n, _ = features.shape

    if n <= SMALL_N:
        # Gridless single shot: the whole problem lives in VMEM, no pipeline/grid-step
        # overhead, no double-buffer allocation.
        return pl.pallas_call(
            _classifier_kernel,
            out_shape=jax.ShapeDtypeStruct((n, NUM_CLASSES), jnp.float32),
            in_specs=[
                pl.BlockSpec(memory_space=pltpu.MemorySpace.VMEM),
                pl.BlockSpec(memory_space=pltpu.MemorySpace.VMEM),
                pl.BlockSpec(memory_space=pltpu.MemorySpace.VMEM),
            ],
            out_specs=pl.BlockSpec(memory_space=pltpu.MemorySpace.VMEM),
        )(features, w_p, b_p)

    # Gridded path: stream raw (un-padded) activation tiles over the batch axis; the
    # padded weight/bias index_maps return the same block every step (VMEM-resident).
    # tile_n gives >=2 grid steps (v7x shards them across its 2 TCs via "parallel"),
    # amortizes per-step overhead, and stays well inside v5e's scoped-VMEM default.
    tile_n = min(MAX_TILE_N, _round_up((n + 1) // 2, 512))
    grid = (pl.cdiv(n, tile_n),)  # ragged last block: OOB rows are read-don't-care, writes clipped
    return pl.pallas_call(
        _classifier_kernel,
        out_shape=jax.ShapeDtypeStruct((n, NUM_CLASSES), jnp.float32),
        grid=grid,
        in_specs=[
            pl.BlockSpec((tile_n, IN_FEATURES), lambda i: (i, 0)),
            pl.BlockSpec((IN_FEATURES, PAD_C), lambda i: (0, 0)),
            pl.BlockSpec((1, PAD_C), lambda i: (0, 0)),
        ],
        out_specs=pl.BlockSpec((tile_n, NUM_CLASSES), lambda i: (i, 0)),
        compiler_params=pltpu.CompilerParams(
            dimension_semantics=("parallel",),  # v7x: shard batch tiles across 2 TCs
        ),
    )(features, w_p, b_p)


def init_params(key):
    """Deterministic init mimicking nn.Linear defaults: U(-1/sqrt(fan_in), 1/sqrt(fan_in))."""
    kw, kb = jax.random.split(key)
    bound = 1.0 / jnp.sqrt(jnp.float32(IN_FEATURES))
    # Stored as (in_features, out_features) == PyTorch weight.T
    weight_t = jax.random.uniform(
        kw, (IN_FEATURES, NUM_CLASSES), dtype=jnp.float32, minval=-bound, maxval=bound
    )
    bias = jax.random.uniform(
        kb, (NUM_CLASSES,), dtype=jnp.float32, minval=-bound, maxval=bound
    )
    return weight_t, bias


if __name__ == "__main__":
    key = jax.random.PRNGKey(0)
    k_small, k_large, k_params = jax.random.split(key, 3)

    weight_t, bias = init_params(k_params)
    w_p, b_p = prepare_params(weight_t, bias)  # padded once, reused every call

    # Small batch -> exercises the gridless single-shot path.
    batch_small = 8
    feats_small = jax.random.normal(k_small, (batch_small, IN_FEATURES), dtype=jnp.float32)
    logits_small = jax.block_until_ready(phase_a_net_forward(feats_small, w_p, b_p))
    ref_small = feats_small @ weight_t + bias[None, :]
    assert logits_small.shape == (batch_small, NUM_CLASSES)
    assert jnp.allclose(logits_small, ref_small, atol=1e-5, rtol=1e-5)

    # Larger batch, NOT a multiple of the tile -> exercises the batch-tiled 'parallel'
    # path with a ragged last block (1000 = 512 + 488).
    batch_large = 1000
    feats_large = jax.random.normal(k_large, (batch_large, IN_FEATURES), dtype=jnp.float32)
    logits_large = jax.block_until_ready(phase_a_net_forward(feats_large, w_p, b_p))
    ref_large = feats_large @ weight_t + bias[None, :]
    assert logits_large.shape == (batch_large, NUM_CLASSES)
    assert jnp.allclose(logits_large, ref_large, atol=1e-5, rtol=1e-5)

    print("KERNEL_OK")
</pallas_src>

<mosaic_0001>
module attributes {stable_mosaic.version = 11 : i64} {
  func.func @_classifier_kernel(%arg0: memref<8x200xf32, #tpu.memory_space<vmem>>, %arg1: memref<200x128xf32, #tpu.memory_space<vmem>>, %arg2: memref<1x128xf32, #tpu.memory_space<vmem>>, %arg3: memref<8x10xf32, #tpu.memory_space<vmem>>) attributes {dimension_semantics = [], scalar_prefetch = 0 : i64, scratch_operands = 0 : i64, tpu.core_type = #tpu.core_type<tc>} {
    %c0 = arith.constant 0 : index
    %c0_0 = arith.constant 0 : index
    %0 = vector.load %arg0[%c0, %c0_0] : memref<8x200xf32, #tpu.memory_space<vmem>>, vector<8x200xf32>
    %c0_1 = arith.constant 0 : index
    %c0_2 = arith.constant 0 : index
    %1 = vector.load %arg1[%c0_1, %c0_2] : memref<200x128xf32, #tpu.memory_space<vmem>>, vector<200x128xf32>
    %cst = arith.constant dense<0.000000e+00> : vector<8x128xf32>
    %2 = tpu.matmul %0, %1, %cst {dimension_numbers = #tpu.dot_dimension_numbers<[1], [0], [0], [1], [0, 0, 1, 1], [], []>} : vector<8x200xf32>, vector<200x128xf32>, vector<8x128xf32> -> vector<8x128xf32>
    %c0_3 = arith.constant 0 : index
    %c0_4 = arith.constant 0 : index
    %3 = vector.load %arg2[%c0_3, %c0_4] : memref<1x128xf32, #tpu.memory_space<vmem>>, vector<1x128xf32>
    %4 = vector.broadcast %3 : vector<1x128xf32> to vector<8x128xf32>
    %5 = arith.addf %2, %4 : vector<8x128xf32>
    %6 = vector.extract_strided_slice %5 {offsets = [0, 0], sizes = [8, 10], strides = [1, 1]} : vector<8x128xf32> to vector<8x10xf32>
    %c0_5 = arith.constant 0 : index
    %c0_6 = arith.constant 0 : index
    %7 = vector.load %arg3[%c0_5, %c0_6] : memref<8x10xf32, #tpu.memory_space<vmem>>, vector<8x10xf32>
    tpu.vector_store %arg3[%c0_5, %c0_6], %6 {strides = array<i32>} : memref<8x10xf32, #tpu.memory_space<vmem>>, vector<8x10xf32>,
    return
  }
}

</mosaic_0001>

<bundles_post_ra>
// kernel: phase_a_net_forward.1
= control target key start
LH: loop header
LB: loop body
LE: loop exit
PB: predicated region body
PF: predicated region fallthrough
CT: control target
= control target key end

     0   :  { %8 = vsyncpa [#allocation3], 0  ;;  %s262_s0 = inlined_call_operand.hbm [shape: f32[8,200], index: 0, kind: input, shape index: {}]   ;;  %s263_s1 = inlined_call_operand.hbm [shape: f32[200,128], index: 1, kind: input, shape index: {}]   ;;  %s264_s2 = inlined_call_operand.vmem [shape: f32[1,128], index: 2, kind: input, shape index: {}]   ;;  %s265_s3 = inlined_call_operand.hbm [shape: f32[8,10], index: 3, kind: output, shape index: {}]  }
   0x1   :  { %9 = vsyncpa [#allocation6], 0 }
   0x2   :  { %10 = vsyncpa [#allocation4], 0  ;;  %s16_s14 = sshll.u32 %s262_s0, 4  ;;  %s225_s15 = smov [#allocation2]   ;;  %s17_s14 = int_to_ptr.hbm [resolvable:$true] %s16_s14 }
   0x3   :  { %s18_s16 = sshll.u32 %s225_s15, 4  ;;  %s26_s19 = sshll.u32 %s263_s1, 4  ;;  %s19_s16 = int_to_ptr.vmem [resolvable:$true] %s18_s16  ;;  %s27_s19 = int_to_ptr.hbm [resolvable:$true] %s26_s19 }
   0x4   :  { %21 = dma.hbm_to_vmem [thread:$0]  %s17_s14, 256, %s19_s16, [#allocation3]  }
   0x5   :  { %s226_s20 = smov [#allocation5]   ;;  %s227_s22 = smov 128  }
   0x6   :  { %s28_s21 = sshll.u32 %s226_s20, 4  ;;  %s228_s23 = smov 8   ;;  %s29_s21 = int_to_ptr.vmem [resolvable:$true] %s28_s21 }
   0x7   :  { %34 = dma.hbm_to_vmem [thread:$0]  %s27_s19, 3200, %s29_s21, [#allocation6], %s227_s22, %s227_s22, %s228_s23  }
   0x8   :  { %219 = dma.done.wait [#allocation3], 256  }
   0x9   :  { %220 = vsyncadd [#allocation3], 4294967040 }
   0xa   :  { %221 = dma.done.wait [#allocation6], 3200  }
   0xb   :  { %222 = vsyncadd [#allocation6], 4294964096  ;;  %v62_v0 = vld [vmem:[#allocation5 + $0x78] sm:$0xff]  ;;  %v61_v1 = vld [vmem:[#allocation5 + $0x70] sm:$0xff]  ;;  %vm76_vm0 = vcmask 588800   ;;  %s229_s24 = smov [#allocation7]  }
   0xc   :  { %80 = vmatpush.msra.mxu0 %v62_v0  ;;  %v60_v2 = vld [vmem:[#allocation5 + $0x68] sm:$0xff]  ;;  %v71_v3 = vld [vmem:[#allocation5 + $0xc0] sm:$0xff]  ;;  %v70_v4 = vld [vmem:[#allocation5 + $0xb8] sm:$0xff]  ;;  %s127_s25 = sshll.u32 %s229_s24, 4  ;;  %s129_s28 = sshll.u32 %s265_s3, 4  ;;  %vm120_vm1 = vcmask 80896   ;;  %s128_s25 = int_to_ptr.vmem [resolvable:$true] %s127_s25  ;;  %s130_s28 = int_to_ptr.hbm [resolvable:$true] %s129_s28 }
   0xd   :  { %v59_v5 = vld [vmem:[#allocation5 + $0x60] sm:$0xff]  ;;  %107 = vmatpush.msra.mxu1 %v71_v3  ;;  %v69_v6 = vld [vmem:[#allocation5 + $0xb0] sm:$0xff]  ;;  %v58_v7 = vld [vmem:[#allocation5 + $0x58] sm:$0xff] }
   0xe   :  { %81 = vmatpush.msra.mxu0 %v61_v1  ;;  %v68_v8 = vld [vmem:[#allocation5 + $0xa8] sm:$0xff]  ;;  %v57_v9 = vld [vmem:[#allocation5 + $0x50] sm:$0xff]  ;;  %v67_v10 = vld [vmem:[#allocation5 + $0xa0] sm:$0xff] }
   0xf   :  { %108 = vmatpush.msra.mxu1 %v70_v4  ;;  %v56_v11 = vld [vmem:[#allocation5 + $0x48] sm:$0xff]  ;;  %v66_v12 = vld [vmem:[#allocation5 + $0x98] sm:$0xff]  ;;  %v55_v13 = vld [vmem:[#allocation5 + $0x40] sm:$0xff] }
  0x10   :  { %82 = vmatpush.msra.mxu0 %v60_v2  ;;  %v65_v14 = vld [vmem:[#allocation5 + $0x90] sm:$0xff]  ;;  %v54_v15 = vld [vmem:[#allocation5 + $0x38] sm:$0xff]  ;;  %v64_v16 = vld [vmem:[#allocation5 + $0x88] sm:$0xff] }
  0x11   :  { %109 = vmatpush.msra.mxu1 %v69_v6  ;;  %v53_v17 = vld [vmem:[#allocation5 + $0x30] sm:$0xff]  ;;  %v63_v18 = vld [vmem:[#allocation5 + $0x80] sm:$0xff]  ;;  %v52_v19 = vld [vmem:[#allocation5 + $0x28] sm:$0xff] }
  0x12   :  { %83 = vmatpush.msra.mxu0 %v59_v5  ;;  %v46_v20 = vld [vmem:[#allocation2 + $0x8] sm:$0xff]  ;;  %v51_v21 = vld [vmem:[#allocation5 + $0x20] sm:$0xff]  ;;  %v49_v23 = vld [vmem:[#allocation5 + $0x10] sm:$0xff] }
  0x13   :  { %110 = vmatpush.msra.mxu1 %v68_v8  ;;  %v50_v22 = vld [vmem:[#allocation5 + $0x18] sm:$0xff]  ;;  %v48_v24 = vld [vmem:[#allocation5 + $0x8] sm:$0xff]  ;;  %v47_v25 = vld [vmem:[#allocation5] sm:$0xff] }
  0x14   :  { %84 = vmatpush.msra.mxu0 %v58_v7  ;;  %v45_v26 = vld [vmem:[#allocation2] sm:$0xff] }
  0x15   :  { %111 = vmatpush.msra.mxu1 %v67_v10  ;;  %v146_v27 = vld [vmem:[%s264_s2] ss:$0 sm:$0xff] }
  0x16   :  { %85 = vmatpush.msra.mxu0 %v57_v9 }
  0x17   :  { %112 = vmatpush.msra.mxu1 %v66_v12 }
  0x18   :  { %86 = vmatpush.msra.mxu0 %v56_v11 }
  0x19   :  { %113 = vmatpush.msra.mxu1 %v65_v14 }
  0x1a   :  { %87 = vmatpush.msra.mxu0 %v55_v13 }
  0x1b   :  { %114 = vmatpush.msra.mxu1 %v64_v16 }
  0x1c   :  { %88 = vmatpush.msra.mxu0 %v54_v15 }
  0x1d   :  { %115 = vmatpush.msra.mxu1 %v63_v18 }
  0x1e   :  { %89 = vmatpush.msra.mxu0 %v53_v17  ;;  %140 = vmatmul.msk.f32.vlgmr.msra.gmra.mxu1 %vm76_vm0, %v46_v20 }
  0x20   :  { %90 = vmatpush.msra.mxu0 %v52_v19 }
  0x22   :  { %91 = vmatpush.msra.mxu0 %v51_v21 }
  0x24   :  { %92 = vmatpush.msra.mxu0 %v50_v22 }
  0x26   :  { %93 = vmatpush.msra.mxu0 %v49_v23 }
  0x28   :  { %94 = vmatpush.msra.mxu0 %v48_v24 }
  0x2a   :  { %95 = vmatpush.msra.mxu0 %v47_v25 }
  0x2b   :  { %96 = vmatmul.f32.vlgmr.msra.gmra.mxu0 %v45_v26 }
  0x9b   :  { %v117_v29 = vpop.f32.mrf.mxu1 }
  0xa8   :  { %v97_v28 = vpop.f32.mrf.mxu0 }
  0xa9   :  { %v98_v30 = vadd.f32 %v146_v27, %v97_v28 }
  0xab   :  { %v118_v31 = vadd.f32 %v117_v29, %v98_v30 }
  0xad   :  { %121 = vst.msk [vmem:[#allocation7] sm:$0xff] %vm120_vm1, %v118_v31 }
  0xae   :  { %132 = dma.vmem_to_hbm [thread:$0]  %s128_s25, 128, %s130_s28, [#allocation4]  }
  0xaf   :  { %223 = dma.done.wait [#allocation4], 128  }
  0xb0   :  { %224 = vsyncadd [#allocation4], 4294967168 }
  0xb1   :  { %137 = vsyncpa [#allocation3], 1 }
  0xb2   :  { %138 = vsyncpa [#allocation6], 1 }
  0xb3   :  { %139 = vsyncpa [#allocation4], 1 }

</bundles_post_ra>
